<compile_context>
chip_gen: v7x
topology: tpu7x:2x2x1
jax: 0.10.0
libtpu: 0.0.40
codegen_flags: <defaults>
</compile_context>

<pallas_src>
import jax
import jax.numpy as jnp
from jax.experimental import pallas as pl
from jax.experimental.pallas import tpu as pltpu

BN_EPS = 1e-5


# ---------------------------------------------------------------------------
# Kernel 1: temporal-attention pooling (batch-tiled, pipelined, bf16 stream)
# ---------------------------------------------------------------------------
def attn_pool_kernel(x_ref, wa_ref, pooled_ref):
    # x_ref:      (tb, T, D)  batch tile of the input sequence (streamed from HBM)
    # wa_ref:     (1, D)      temporal_attn Linear weight, VMEM-resident across grid
    # pooled_ref: (tb, D)     attention-pooled features (f32, lane/sublane dense)
    x = x_ref[...].astype(jnp.float32)                     # (tb, T, D)
    wa = wa_ref[...].astype(jnp.float32)                   # (1, D)

    # Attention logits over time: VPU multiply + lane reduce over D
    # (avoids tb serial singleton-M MXU pushes).
    s = jnp.sum(x * wa[None, :, :], axis=-1)               # (tb, T)

    # Softmax over time.  The Linear bias is shift-invariant under softmax and
    # is dropped; exact divide is free since the kernel is DMA bound.
    m = jnp.max(s, axis=-1, keepdims=True)
    e = jnp.exp(s - m)
    attn = e / jnp.sum(e, axis=-1, keepdims=True)           # (tb, T), f32

    # Weighted temporal pooling: VPU multiply + sublane reduce over T.
    pooled = jnp.sum(x * attn[:, :, None], axis=1)          # (tb, D)
    pooled_ref[...] = pooled.astype(pooled_ref.dtype)


# ---------------------------------------------------------------------------
# Kernel 2: Linear -> BatchNorm1d (batch stats) -> ReLU -> Linear
# ---------------------------------------------------------------------------
def projection_bn_kernel(pooled_ref, w1_ref, b1_ref, gamma_ref, beta_ref,
                         w2_ref, b2_ref, o_ref):
    pooled = pooled_ref[...].astype(jnp.float32)                       # (B, D)

    # projection[0]: Linear(D -> Hp)
    h = jnp.dot(pooled, w1_ref[...], preferred_element_type=jnp.float32) + b1_ref[...]

    # projection[1]: BatchNorm1d, training mode (biased batch stats, full batch)
    mean = jnp.mean(h, axis=0, keepdims=True)
    c = h - mean
    var = jnp.mean(c * c, axis=0, keepdims=True)
    h = c * jax.lax.rsqrt(var + BN_EPS) * gamma_ref[...] + beta_ref[...]

    # projection[2]: ReLU
    h = jnp.maximum(h, 0.0)

    # projection[3]: Linear(Hp -> Op); padded dims carry exact zeros through.
    out = jnp.dot(h, w2_ref[...], preferred_element_type=jnp.float32) + b2_ref[...]
    o_ref[...] = out.astype(o_ref.dtype)


# ---------------------------------------------------------------------------
# Helpers
# ---------------------------------------------------------------------------
def _round_up(v, m):
    return (v + m - 1) // m * m


def _choose_batch_tile(B, T, D, itemsize):
    """Derive the batch tile + VMEM capacity from the current TPU generation."""
    try:
        vmem_bytes = int(pltpu.get_tpu_info().vmem_capacity_bytes)
    except Exception:  # fallback: assume the smallest per-TC VMEM (v7x, 64 MiB)
        vmem_bytes = 64 << 20
    # ~60% of physical VMEM for the double-buffered x tiles, leaving headroom
    # for the pooled output, the resident weight vector and compiler scratch.
    budget = int(vmem_bytes * 0.6)
    row_bytes = T * D * itemsize
    tb = max(budget // (2 * row_bytes), 1)
    # Keep >= ~8 grid steps (>= 3-4 per TensorCore on v7x) so the i+1 prefetch
    # overlaps the x DMA -- but never shrink below a sublane-dense tile of 8.
    tb = min(tb, max(B // 8, 8))
    tb = min(tb, B)
    if tb > 8:
        tb = (tb // 8) * 8          # sublane-dense output stores
    return max(tb, 1), vmem_bytes


# ---------------------------------------------------------------------------
# Wrapper
# ---------------------------------------------------------------------------
@jax.jit
def projection_head(x, params):
    B, T, D = x.shape
    H = params["w1"].shape[1]
    O = params["w2"].shape[1]

    # ---- cast the large activation to bf16 once (halves HBM traffic) ----
    x_c = x.astype(jnp.bfloat16) if x.dtype == jnp.float32 else x
    itemsize = jnp.dtype(x_c.dtype).itemsize

    tb, vmem_bytes = _choose_batch_tile(B, T, D, itemsize)

    # ---- pad a ragged last batch tile (pooling is per-row independent) ----
    Bp = _round_up(B, tb)
    if Bp != B:
        x_c = jnp.pad(x_c, ((0, Bp - B), (0, 0), (0, 0)))

    # ---- VMEM limit derived from the actual tile (no fixed cap) ----
    x_tile_bytes = tb * T * D * itemsize
    out_tile_bytes = tb * D * 4
    needed = 2 * x_tile_bytes + 2 * out_tile_bytes + 2 * D * 4 + (2 << 20)
    vmem_limit = int(min(max(needed, 16 << 20), vmem_bytes))

    # ---- kernel 1: attention pooling, tiled + pipelined over the batch ----
    pooled = pl.pallas_call(
        attn_pool_kernel,
        out_shape=jax.ShapeDtypeStruct((Bp, D), jnp.float32),
        grid=(Bp // tb,),
        in_specs=[
            pl.BlockSpec((tb, T, D), lambda i: (i, 0, 0)),   # streamed x tile
            pl.BlockSpec((1, D), lambda i: (0, 0)),          # wa, VMEM-resident
        ],
        out_specs=pl.BlockSpec((tb, D), lambda i: (i, 0)),
        compiler_params=pltpu.CompilerParams(
            dimension_semantics=("parallel",),
            vmem_limit_bytes=vmem_limit,
        ),
    )(x_c, params["wa"])

    if Bp != B:
        pooled = pooled[:B]   # BatchNorm statistics must see exactly B rows

    # ---- pad hidden / output feature dims to lane-dense multiples of 128 ----
    Hp = _round_up(H, 128)
    Op = _round_up(O, 128)
    w1p, b1p = params["w1"], params["b1"]
    gp, bp = params["gamma"], params["beta"]
    w2p, b2p = params["w2"], params["b2"]
    if Hp != H:
        w1p = jnp.pad(w1p, ((0, 0), (0, Hp - H)))
        b1p = jnp.pad(b1p, ((0, 0), (0, Hp - H)))
        gp = jnp.pad(gp, ((0, 0), (0, Hp - H)))
        bp = jnp.pad(bp, ((0, 0), (0, Hp - H)))
        w2p = jnp.pad(w2p, ((0, Hp - H), (0, 0)))
    if Op != O:
        w2p = jnp.pad(w2p, ((0, 0), (0, Op - O)))
        b2p = jnp.pad(b2p, ((0, 0), (0, Op - O)))

    # ---- kernel 2: MLP head with exact full-batch BatchNorm statistics ----
    vmem = pl.BlockSpec(memory_space=pltpu.MemorySpace.VMEM)
    out_padded = pl.pallas_call(
        projection_bn_kernel,
        out_shape=jax.ShapeDtypeStruct((B, Op), jnp.float32),
        in_specs=[vmem] * 7,
        out_specs=vmem,
    )(pooled, w1p, b1p, gp, bp, w2p, b2p)

    return out_padded[:, :O]


# ---------------------------------------------------------------------------
# Parameters / reference
# ---------------------------------------------------------------------------
def init_params(key, input_dim, hidden_dim, output_dim):
    ks = jax.random.split(key, 6)
    scale = 0.05
    return {
        # temporal_attn: nn.Linear(input_dim, 1)
        "wa": scale * jax.random.normal(ks[0], (1, input_dim), jnp.float32),
        "ba": scale * jax.random.normal(ks[1], (1, 1), jnp.float32),
        # projection[0]: Linear(input_dim, hidden_dim) (stored input-major)
        "w1": scale * jax.random.normal(ks[2], (input_dim, hidden_dim), jnp.float32),
        "b1": scale * jax.random.normal(ks[3], (1, hidden_dim), jnp.float32),
        # projection[1]: BatchNorm1d(hidden_dim), PyTorch default init
        "gamma": jnp.ones((1, hidden_dim), jnp.float32),
        "beta": jnp.zeros((1, hidden_dim), jnp.float32),
        # projection[3]: Linear(hidden_dim, output_dim) (stored input-major)
        "w2": scale * jax.random.normal(ks[4], (hidden_dim, output_dim), jnp.float32),
        "b2": scale * jax.random.normal(ks[5], (1, output_dim), jnp.float32),
    }


def projection_head_ref(x, p):
    """Pure-JAX reference mirroring the PyTorch forward (training-mode BN)."""
    logits = jnp.einsum("btd,d->bt", x, p["wa"][0]) + p["ba"][0, 0]
    attn = jax.nn.softmax(logits, axis=1)[..., None]
    pooled = jnp.sum(x * attn, axis=1)
    h = pooled @ p["w1"] + p["b1"]
    mean = jnp.mean(h, axis=0, keepdims=True)
    var = jnp.mean((h - mean) ** 2, axis=0, keepdims=True)
    h = (h - mean) / jnp.sqrt(var + BN_EPS) * p["gamma"] + p["beta"]
    h = jnp.maximum(h, 0.0)
    return h @ p["w2"] + p["b2"]


if __name__ == "__main__":
    # batch, seq, input_dim, hidden_dim, output_dim (small; grid still has 2 steps)
    B, T, D, H, O = 16, 8, 32, 32, 16
    key = jax.random.PRNGKey(0)
    kx, kp = jax.random.split(key)
    x = jax.random.normal(kx, (B, T, D), jnp.float32)
    params = init_params(kp, D, H, O)

    out = projection_head(x, params)
    out = jax.block_until_ready(out)
    assert out.shape == (B, O)

    ref = projection_head_ref(x, params)
    # x is streamed to kernel 1 in bf16 -> small quantization vs the f32 reference;
    # all in-kernel math (softmax, pooling accumulation, BN, matmuls) is f32.
    assert jnp.allclose(out, ref, atol=2e-2, rtol=2e-2), "kernel/reference mismatch"

    print("KERNEL_OK")
</pallas_src>

<mosaic_0001>
module attributes {stable_mosaic.version = 11 : i64} {
  func.func @attn_pool_kernel(%arg0: i32, %arg1: memref<8x8x32xbf16, #tpu.memory_space<vmem>>, %arg2: memref<1x32xf32, #tpu.memory_space<vmem>>, %arg3: memref<8x32xf32, #tpu.memory_space<vmem>>) attributes {dimension_semantics = [#tpu.dimension_semantics<parallel>], iteration_bounds = array<i64: 2>, scalar_prefetch = 0 : i64, scratch_operands = 0 : i64, tpu.core_type = #tpu.core_type<tc>, window_params = [{transform_indices = @transform_0, window_bounds = array<i64: 8, 8, 32>}, {pipeline_mode = #tpu.pipeline_mode<synchronous>, transform_indices = @transform_1, window_bounds = array<i64: 1, 32>}, {transform_indices = @transform_2, window_bounds = array<i64: 8, 32>}]} {
    %c0 = arith.constant 0 : index
    %c0_0 = arith.constant 0 : index
    %c0_1 = arith.constant 0 : index
    %0 = vector.load %arg1[%c0, %c0_0, %c0_1] : memref<8x8x32xbf16, #tpu.memory_space<vmem>>, vector<8x8x32xbf16>
    %1 = arith.extf %0 : vector<8x8x32xbf16> to vector<8x8x32xf32>
    %c0_2 = arith.constant 0 : index
    %c0_3 = arith.constant 0 : index
    %2 = vector.load %arg2[%c0_2, %c0_3] : memref<1x32xf32, #tpu.memory_space<vmem>>, vector<1x32xf32>
    %3 = vector.shape_cast %2 : vector<1x32xf32> to vector<1x1x32xf32>
    %4 = vector.broadcast %3 : vector<1x1x32xf32> to vector<8x8x32xf32>
    %5 = arith.mulf %1, %4 : vector<8x8x32xf32>
    %cst = arith.constant dense<0.000000e+00> : vector<8x8xf32>
    %6 = vector.multi_reduction <add>, %5, %cst [2] : vector<8x8x32xf32> to vector<8x8xf32>
    %cst_4 = arith.constant dense<0xFF800000> : vector<8xf32>
    %7 = vector.multi_reduction <maximumf>, %6, %cst_4 [1] : vector<8x8xf32> to vector<8xf32>
    %8 = vector.shape_cast %7 : vector<8xf32> to vector<8x1xf32>
    %9 = vector.broadcast %8 : vector<8x1xf32> to vector<8x8xf32>
    %10 = arith.subf %6, %9 : vector<8x8xf32>
    %11 = math.exp %10 : vector<8x8xf32>
    %cst_5 = arith.constant dense<0.000000e+00> : vector<8xf32>
    %12 = vector.multi_reduction <add>, %11, %cst_5 [1] : vector<8x8xf32> to vector<8xf32>
    %13 = vector.shape_cast %12 : vector<8xf32> to vector<8x1xf32>
    %14 = vector.broadcast %13 : vector<8x1xf32> to vector<8x8xf32>
    %15 = arith.divf %11, %14 : vector<8x8xf32>
    %16 = vector.shape_cast %15 : vector<8x8xf32> to vector<8x8x1xf32>
    %17 = vector.broadcast %16 : vector<8x8x1xf32> to vector<8x8x32xf32>
    %18 = arith.mulf %1, %17 : vector<8x8x32xf32>
    %cst_6 = arith.constant dense<0.000000e+00> : vector<8x32xf32>
    %19 = vector.multi_reduction <add>, %18, %cst_6 [1] : vector<8x8x32xf32> to vector<8x32xf32>
    %c0_7 = arith.constant 0 : index
    %c0_8 = arith.constant 0 : index
    %20 = vector.load %arg3[%c0_7, %c0_8] : memref<8x32xf32, #tpu.memory_space<vmem>>, vector<8x32xf32>
    tpu.vector_store %arg3[%c0_7, %c0_8], %19 {strides = array<i32>} : memref<8x32xf32, #tpu.memory_space<vmem>>, vector<8x32xf32>,
    return
  }
  func.func @transform_0(%arg0: i32) -> (i32, i32, i32) {
    %c0_i32 = arith.constant 0 : i32
    %c0_i32_0 = arith.constant 0 : i32
    %c0_i32_1 = arith.constant 0 : i32
    return %arg0, %c0_i32, %c0_i32_0 : i32, i32, i32
  }
  func.func @transform_1(%arg0: i32) -> (i32, i32) {
    %c0_i32 = arith.constant 0 : i32
    %c0_i32_0 = arith.constant 0 : i32
    %c0_i32_1 = arith.constant 0 : i32
    return %c0_i32, %c0_i32_0 : i32, i32
  }
  func.func @transform_2(%arg0: i32) -> (i32, i32) {
    %c0_i32 = arith.constant 0 : i32
    %c0_i32_0 = arith.constant 0 : i32
    return %arg0, %c0_i32 : i32, i32
  }
}

module attributes {stable_mosaic.version = 11 : i64} {
  func.func @projection_bn_kernel(%arg0: memref<16x32xf32, #tpu.memory_space<vmem>>, %arg1: memref<32x128xf32, #tpu.memory_space<vmem>>, %arg2: memref<1x128xf32, #tpu.memory_space<vmem>>, %arg3: memref<1x128xf32, #tpu.memory_space<vmem>>, %arg4: memref<1x128xf32, #tpu.memory_space<vmem>>, %arg5: memref<128x128xf32, #tpu.memory_space<vmem>>, %arg6: memref<1x128xf32, #tpu.memory_space<vmem>>, %arg7: memref<16x128xf32, #tpu.memory_space<vmem>>) attributes {dimension_semantics = [], scalar_prefetch = 0 : i64, scratch_operands = 0 : i64, tpu.core_type = #tpu.core_type<tc>} {
    %c0 = arith.constant 0 : index
    %c0_0 = arith.constant 0 : index
    %0 = vector.load %arg0[%c0, %c0_0] : memref<16x32xf32, #tpu.memory_space<vmem>>, vector<16x32xf32>
    %c0_1 = arith.constant 0 : index
    %c0_2 = arith.constant 0 : index
    %1 = vector.load %arg1[%c0_1, %c0_2] : memref<32x128xf32, #tpu.memory_space<vmem>>, vector<32x128xf32>
    %cst = arith.constant dense<0.000000e+00> : vector<16x128xf32>
    %2 = tpu.matmul %0, %1, %cst {dimension_numbers = #tpu.dot_dimension_numbers<[1], [0], [0], [1], [0, 0, 1, 1], [], []>} : vector<16x32xf32>, vector<32x128xf32>, vector<16x128xf32> -> vector<16x128xf32>
    %c0_3 = arith.constant 0 : index
    %c0_4 = arith.constant 0 : index
    %3 = vector.load %arg2[%c0_3, %c0_4] : memref<1x128xf32, #tpu.memory_space<vmem>>, vector<1x128xf32>
    %4 = vector.broadcast %3 : vector<1x128xf32> to vector<16x128xf32>
    %5 = arith.addf %2, %4 : vector<16x128xf32>
    %cst_5 = arith.constant dense<0.000000e+00> : vector<128xf32>
    %6 = vector.multi_reduction <add>, %5, %cst_5 [0] : vector<16x128xf32> to vector<128xf32>
    %7 = vector.shape_cast %6 : vector<128xf32> to vector<1x128xf32>
    %cst_6 = arith.constant 1.600000e+01 : f32
    %8 = vector.broadcast %cst_6 : f32 to vector<1x128xf32>
    %9 = arith.divf %7, %8 : vector<1x128xf32>
    %10 = vector.broadcast %9 : vector<1x128xf32> to vector<16x128xf32>
    %11 = arith.subf %5, %10 : vector<16x128xf32>
    %12 = arith.mulf %11, %11 : vector<16x128xf32>
    %cst_7 = arith.constant dense<0.000000e+00> : vector<128xf32>
    %13 = vector.multi_reduction <add>, %12, %cst_7 [0] : vector<16x128xf32> to vector<128xf32>
    %14 = vector.shape_cast %13 : vector<128xf32> to vector<1x128xf32>
    %cst_8 = arith.constant 1.600000e+01 : f32
    %15 = vector.broadcast %cst_8 : f32 to vector<1x128xf32>
    %16 = arith.divf %14, %15 : vector<1x128xf32>
    %cst_9 = arith.constant 9.99999974E-6 : f32
    %17 = vector.broadcast %cst_9 : f32 to vector<1x128xf32>
    %18 = arith.addf %16, %17 : vector<1x128xf32>
    %19 = math.rsqrt %18 : vector<1x128xf32>
    %20 = vector.broadcast %19 : vector<1x128xf32> to vector<16x128xf32>
    %21 = arith.mulf %11, %20 : vector<16x128xf32>
    %c0_10 = arith.constant 0 : index
    %c0_11 = arith.constant 0 : index
    %22 = vector.load %arg3[%c0_10, %c0_11] : memref<1x128xf32, #tpu.memory_space<vmem>>, vector<1x128xf32>
    %23 = vector.broadcast %22 : vector<1x128xf32> to vector<16x128xf32>
    %24 = arith.mulf %21, %23 : vector<16x128xf32>
    %c0_12 = arith.constant 0 : index
    %c0_13 = arith.constant 0 : index
    %25 = vector.load %arg4[%c0_12, %c0_13] : memref<1x128xf32, #tpu.memory_space<vmem>>, vector<1x128xf32>
    %26 = vector.broadcast %25 : vector<1x128xf32> to vector<16x128xf32>
    %27 = arith.addf %24, %26 : vector<16x128xf32>
    %cst_14 = arith.constant 0.000000e+00 : f32
    %28 = vector.broadcast %cst_14 : f32 to vector<16x128xf32>
    %29 = arith.maximumf %27, %28 : vector<16x128xf32>
    %c0_15 = arith.constant 0 : index
    %c0_16 = arith.constant 0 : index
    %30 = vector.load %arg5[%c0_15, %c0_16] : memref<128x128xf32, #tpu.memory_space<vmem>>, vector<128x128xf32>
    %cst_17 = arith.constant dense<0.000000e+00> : vector<16x128xf32>
    %31 = tpu.matmul %29, %30, %cst_17 {dimension_numbers = #tpu.dot_dimension_numbers<[1], [0], [0], [1], [0, 0, 1, 1], [], []>} : vector<16x128xf32>, vector<128x128xf32>, vector<16x128xf32> -> vector<16x128xf32>
    %c0_18 = arith.constant 0 : index
    %c0_19 = arith.constant 0 : index
    %32 = vector.load %arg6[%c0_18, %c0_19] : memref<1x128xf32, #tpu.memory_space<vmem>>, vector<1x128xf32>
    %33 = vector.broadcast %32 : vector<1x128xf32> to vector<16x128xf32>
    %34 = arith.addf %31, %33 : vector<16x128xf32>
    %c0_20 = arith.constant 0 : index
    %c0_21 = arith.constant 0 : index
    %35 = vector.load %arg7[%c0_20, %c0_21] : memref<16x128xf32, #tpu.memory_space<vmem>>, vector<16x128xf32>
    tpu.vector_store %arg7[%c0_20, %c0_21], %34 {strides = array<i32>} : memref<16x128xf32, #tpu.memory_space<vmem>>, vector<16x128xf32>,
    return
  }
}

</mosaic_0001>

<bundles_post_ra>
// kernel: projection_head.2
= control target key start
LH: loop header
LB: loop body
LE: loop exit
PB: predicated region body
PF: predicated region fallthrough
CT: control target
= control target key end

     0   :  { %s729_s9 = smov 0   ;;  %s931_s0 = inlined_call_operand.vmem [shape: bf16[16,8,32], index: 0, kind: input, shape index: {}]   ;;  %s932_s1 = inlined_call_operand.vmem [shape: f32[1,32], index: 1, kind: input, shape index: {}]   ;;  %s933_s2 = inlined_call_operand.vmem [shape: f32[16,32], index: 2, kind: output, shape index: {}]  }
   0x1 LB: > { %s735_s10 = sadd.s32 4294967295, %s711_s9   ;;  %p636_p0 = scmp.ge.s32.totalorder %s711_s9, 1  ;;  %s711_s9 = sphi %s729_s9, %s12_s9  }
   0x2   : > { %p113_p1 = scmp.lt.s32.totalorder %s711_s9, 3 }
   0x4   : > { %p114_p2 = pnand %p636_p0, %p113_p1 }
   0x5   : > { %s637_s11 = sshll.u32 (!%p114_p2), %s735_s10, 3  ;;  %v640_v0 = vld [vmem:[%s932_s1] ss:$0 sm:$0xff] (!%p114_p2)  ;;  %vm175_vm0 = vcmask (!%p114_p2), 261120   ;;  %v208_v29 = vlaneseq (!%p114_p2)  ;;  %vm242_vm1 = vcmask (!%p114_p2), 1041409   ;;  %vm244_vm2 = vcmask (!%p114_p2), 1042434  }
   0x6   : > { %117 = sbr.rel (%p114_p2) target bundleno = 826 (0x33a), region = 28  ;;  %p135_p3 = scmp.lt.s32.totalorder (!%p114_p2), %s637_s11, 15  ;;  %vm246_vm3 = vcmask (!%p114_p2), 1043459   ;;  %vm248_vm4 = vcmask (!%p114_p2), 1044484   ;;  %vm250_vm5 = vcmask (!%p114_p2), 1045509   ;;  %vm252_vm6 = vcmask (!%p114_p2), 1046534  }
   0x7   : > { %v209_v30 = vand.u32 (!%p114_p2), 127, %v208_v29  ;;  %v786_v31 = vshrl.u32 (!%p114_p2), %v208_v29, 7  ;;  %vm254_vm7 = vcmask (!%p114_p2), 1047559   ;;  %vm257_vm8 = vcmask (!%p114_p2), 64512   ;;  %p140_p4 = scmp.lt.s32.totalorder (!%p114_p2), %s735_s10, 1 }
   0x8   : > { %v713_v57 = vmov (!%p114_p2), 0  }
   0x9   : > { %v789_v34 = vsub.s32 (!%p114_p2), %v209_v30, %v786_v31  ;;  %672 = vset.pattern.permute.xlu0 (!%p114_p2), %v713_v57  ;;  %671 = vset.pattern.permute.xlu1 (!%p114_p2), %v713_v57  ;;  %v264_v58 = vsub.s32 (!%p114_p2), 0, %v786_v31  ;;  %v268_v59 = vsub.s32 (!%p114_p2), 1, %v786_v31  ;;  %v272_v60 = vsub.s32 (!%p114_p2), 2, %v786_v31 }
   0xa   : > { %v276_v61 = vsub.s32 (!%p114_p2), 3, %v786_v31  ;;  %v292_v29 = vsub.s32 (!%p114_p2), 7, %v786_v31 }
   0xd   : > { %s935_s11 = smov (!%p135_p3, %s637_s11), 15  ;;  %s937_s10 = smov (!%p140_p4, %s735_s10), 1 }
   0xe   : > { %s638_s12 = sshll.u32 %s935_s11, 2  ;;  %s639_s18 = sshll.u32 %s937_s10, 3 }
   0xf   : > { %s138_s15 = scalar_lea.vmem %s931_s0, %s638_s12  ;;  %s143_s21 = scalar_lea.vmem %s933_s2, %s639_s18 }
  0x10   : > { %v746_v1 = vld [vmem:[%s138_s15] sm:$0xff]   ;;  %v748_v2 = vld [vmem:[%s138_s15 + $0x8] sm:$0xff]   ;;  %v750_v3 = vld [vmem:[%s138_s15 + $0x10] sm:$0xff]  }
  0x11   : > { %v645_v4 = vunpack.c.l.bf16 %v746_v1  ;;  %v649_v5 = vunpack.c.l.bf16 %v748_v2  ;;  %v646_v6 = vunpack.c.h.bf16 %v746_v1  ;;  %v650_v7 = vunpack.c.h.bf16 %v748_v2  ;;  %v766_v14 = vld [vmem:[%s138_s15 + $0x18] sm:$0xff]  }
  0x12   : > { %v653_v8 = vunpack.c.l.bf16 %v750_v3  ;;  %v654_v9 = vunpack.c.h.bf16 %v750_v3  ;;  %v657_v17 = vunpack.c.l.bf16 %v766_v14  ;;  %v658_v18 = vunpack.c.h.bf16 %v766_v14 }
  0x13   : > { %v167_v10 = vmul.f32 %v645_v4, %v640_v0  ;;  %v169_v11 = vmul.f32 %v649_v5, %v640_v0  ;;  %v168_v12 = vmul.f32 %v646_v6, %v640_v0  ;;  %v170_v13 = vmul.f32 %v650_v7, %v640_v0 }
  0x14   : > { %v171_v21 = vmul.f32 %v653_v8, %v640_v0  ;;  %v172_v22 = vmul.f32 %v654_v9, %v640_v0  ;;  %v173_v25 = vmul.f32 %v657_v17, %v640_v0  ;;  %v174_v26 = vmul.f32 %v658_v18, %v640_v0 }
  0x15   : > { %v176_v15 = vsel %vm175_vm0, %v167_v10, 0.0  ;;  %v182_v16 = vsel %vm175_vm0, %v169_v11, 0.0  ;;  %v179_v19 = vsel %vm175_vm0, %v168_v12, 0.0  ;;  %v185_v20 = vsel %vm175_vm0, %v170_v13, 0.0 }
  0x16   : > { %177 = vadd.xlane.f32.xlu0 %v176_v15  ;;  %183 = vadd.xlane.f32.xlu1 %v182_v16  ;;  %v188_v23 = vsel %vm175_vm0, %v171_v21, 0.0  ;;  %v191_v24 = vsel %vm175_vm0, %v172_v22, 0.0  ;;  %v194_v27 = vsel %vm175_vm0, %v173_v25, 0.0  ;;  %v197_v28 = vsel %vm175_vm0, %v174_v26, 0.0 }
  0x17   : > { %v280_v11 = vsub.s32 4, %v786_v31  ;;  %v284_v21 = vsub.s32 5, %v786_v31  ;;  %v288_v25 = vsub.s32 6, %v786_v31 }
  0x1a   : > { %180 = vadd.xlane.f32.xlu0 %v179_v19  ;;  %186 = vadd.xlane.f32.xlu1 %v185_v20 }
  0x1e   : > { %189 = vadd.xlane.f32.xlu0 %v188_v23  ;;  %192 = vadd.xlane.f32.xlu1 %v191_v24 }
  0x22   : > { %195 = vadd.xlane.f32.xlu0 %v194_v27  ;;  %198 = vadd.xlane.f32.xlu1 %v197_v28 }
  0xa3   : > { %v178_v32 = vpop.xlane.xlu0 %177  ;;  %v184_v33 = vpop.xlane.xlu1 %183 }
  0xa4   : > { %v213_v37 = vrot.slane %v178_v32, %v789_v34  ;;  %v221_v40 = vrot.slane %v184_v33, %v789_v34 }
  0xa7   : > { %v181_v35 = vpop.xlane.xlu0 %180  ;;  %v187_v36 = vpop.xlane.xlu1 %186 }
  0xa8   : > { %v217_v38 = vrot.slane %v181_v35, %v789_v34  ;;  %v225_v39 = vrot.slane %v187_v36, %v789_v34 }
  0xaa   : > { %v243_v41 = vsel %vm242_vm1, %v217_v38, %v213_v37 }
  0xab   : > { %v245_v42 = vsel %vm244_vm2, %v221_v40, %v243_v41  ;;  %v190_v43 = vpop.xlane.xlu0 %189  ;;  %v193_v44 = vpop.xlane.xlu1 %192 }
  0xac   : > { %v247_v45 = vsel %vm246_vm3, %v225_v39, %v245_v42  ;;  %v229_v46 = vrot.slane %v190_v43, %v789_v34  ;;  %v233_v47 = vrot.slane %v193_v44, %v789_v34 }
  0xae   : > { %v249_v48 = vsel %vm248_vm4, %v229_v46, %v247_v45 }
  0xaf   : > { %v196_v49 = vpop.xlane.xlu0 %195  ;;  %v199_v50 = vpop.xlane.xlu1 %198  ;;  %v251_v53 = vsel %vm250_vm5, %v233_v47, %v249_v48 }
  0xb0   : > { %v237_v51 = vrot.slane %v196_v49, %v789_v34  ;;  %v241_v52 = vrot.slane %v199_v50, %v789_v34 }
  0xb2   : > { %v253_v54 = vsel %vm252_vm6, %v237_v51, %v251_v53 }
  0xb3   : > { %v255_v55 = vsel %vm254_vm7, %v241_v52, %v253_v54 }
  0xb4   : > { %v258_v56 = vsel %vm257_vm8, %v255_v55, -inf }
  0xb5   : > { %259 = vmax.xlane.f32.xlu0 %v258_v56 }
 0x142   : > { %v260_v62 = vpop.xlane.xlu0 %259 }
 0x143   : > { %v265_v63 = vrot.slane %v260_v62, %v264_v58  ;;  %v269_v0 = vrot.slane %v260_v62, %v268_v59  ;;  %v273_v10 = vrot.slane %v260_v62, %v272_v60  ;;  %v277_v12 = vrot.slane %v260_v62, %v276_v61 }
 0x144   : > { %v281_v22 = vrot.slane %v260_v62, %v280_v11  ;;  %v285_v26 = vrot.slane %v260_v62, %v284_v21  ;;  %v289_v30 = vrot.slane %v260_v62, %v288_v25  ;;  %v293_v37 = vrot.slane %v260_v62, %v292_v29 }
 0x145   : > { %v302_v13 = vsub.f32 %v178_v32, %v265_v63  ;;  %v303_v15 = vsub.f32 %v181_v35, %v269_v0  ;;  %v304_v16 = vsub.f32 %v184_v33, %v273_v10  ;;  %v305_v23 = vsub.f32 %v187_v36, %v277_v12 }
 0x146   : > { %v306_v27 = vsub.f32 %v190_v43, %v281_v22  ;;  %v307_v32 = vsub.f32 %v193_v44, %v285_v26  ;;  %v308_v38 = vsub.f32 %v196_v49, %v289_v30  ;;  %v309_v41 = vsub.f32 %v199_v50, %v293_v37 }
 0x147   : > { %v310_v19 = vmul.f32 1.442695, %v302_v13  ;;  %v312_v20 = vmul.f32 1.442695, %v303_v15  ;;  %v314_v24 = vmul.f32 1.442695, %v304_v16 }
 0x148   : > { %v316_v28 = vmul.f32 1.442695, %v305_v23  ;;  %v318_v33 = vmul.f32 1.442695, %v306_v27  ;;  %v320_v39 = vmul.f32 1.442695, %v307_v32 }
 0x149   : > { %673 = vpow2.f32 %v310_v19  ;;  %v322_v42 = vmul.f32 1.442695, %v308_v38  ;;  %v324_v44 = vmul.f32 1.442695, %v309_v41 }
 0x14a   : > { %675 = vpow2.f32 %v312_v20 }
 0x14b   : > { %677 = vpow2.f32 %v314_v24 }
 0x14c   : > { %679 = vpow2.f32 %v316_v28 }
 0x14d   : > { %681 = vpow2.f32 %v318_v33 }
 0x14e   : > { %683 = vpow2.f32 %v320_v39 }
 0x14f   : > { %685 = vpow2.f32 %v322_v42 }
 0x150   : > { %687 = vpow2.f32 %v324_v44 }
 0x153   : > { %v674_v35 = vpop.eup %673 }
 0x154   : > { %v829_v36 = vpop.eup %675  ;;  %335 = vperm.xlu1 %671, %v674_v35  }
 0x155   : > { %338 = vperm.xlu0 %672, %v829_v36   ;;  %v834_v40 = vpop.eup %677 }
 0x156   : > { %v837_v43 = vpop.eup %679 }
 0x157   : > { %v840_v45 = vpop.eup %681 }
 0x158   : > { %341 = vperm.xlu1 %671, %v834_v40   ;;  %v843_v46 = vpop.eup %683 }
 0x159   : > { %v846_v47 = vpop.eup %685 }
 0x15a   : > { %v849_v48 = vpop.eup %687 }
 0x15c   : > { %344 = vperm.xlu1 %671, %v837_v43  }
 0x160   : > { %347 = vperm.xlu1 %671, %v840_v45  }
 0x164   : > { %350 = vperm.xlu1 %671, %v843_v46  }
 0x168   : > { %353 = vperm.xlu1 %671, %v846_v47  }
 0x16c   : > { %356 = vperm.xlu1 %671, %v849_v48  }
 0x1d3   : > { %v336_v49 = vpop.permute.xlu1 %335 }
 0x1d4   : > { %v339_v53 = vpop.permute.xlu0 %338  ;;  %v361_v56 = vrot.slane %v336_v49, %v789_v34 }
 0x1d5   : > { %v365_v55 = vrot.slane %v339_v53, %v789_v34 }
 0x1d7   : > { %v342_v50 = vpop.permute.xlu1 %341  ;;  %v390_v10 = vsel %vm242_vm1, %v365_v55, %v361_v56 }
 0x1d8   : > { %v369_v57 = vrot.slane %v342_v50, %v789_v34 }
 0x1da   : > { %v391_v13 = vsel %vm244_vm2, %v369_v57, %v390_v10 }
 0x1db   : > { %v345_v51 = vpop.permute.xlu1 %344 }
 0x1dc   : > { %v373_v62 = vrot.slane %v345_v51, %v789_v34 }
 0x1de   : > { %v392_v16 = vsel %vm246_vm3, %v373_v62, %v391_v13 }
 0x1df   : > { %v348_v52 = vpop.permute.xlu1 %347 }
 0x1e0   : > { %v377_v63 = vrot.slane %v348_v52, %v789_v34 }
 0x1e2   : > { %v393_v19 = vsel %vm248_vm4, %v377_v63, %v392_v16 }
 0x1e3   : > { %v351_v54 = vpop.permute.xlu1 %350 }
 0x1e4   : > { %v381_v12 = vrot.slane %v351_v54, %v789_v34 }
 0x1e6   : > { %v394_v22 = vsel %vm250_vm5, %v381_v12, %v393_v19 }
 0x1e7   : > { %v354_v0 = vpop.permute.xlu1 %353 }
 0x1e8   : > { %v385_v15 = vrot.slane %v354_v0, %v789_v34 }
 0x1ea   : > { %v395_v24 = vsel %vm252_vm6, %v385_v15, %v394_v22 }
 0x1eb   : > { %v357_v20 = vpop.permute.xlu1 %356 }
 0x1ec   : > { %v389_v23 = vrot.slane %v357_v20, %v789_v34 }
 0x1ee   : > { %v396_v26 = vsel %vm254_vm7, %v389_v23, %v395_v24 }
 0x1ef   : > { %v398_v27 = vsel %vm257_vm8, %v396_v26, 0.0 }
 0x1f0   : > { %399 = vadd.xlane.f32.xlu1 %v398_v27 }
 0x27d   : > { %v400_v28 = vpop.xlane.xlu1 %399 }
 0x27e   : > { %v405_v30 = vrot.slane %v400_v28, %v264_v58  ;;  %v409_v32 = vrot.slane %v400_v28, %v268_v59  ;;  %v413_v33 = vrot.slane %v400_v28, %v272_v60  ;;  %v417_v34 = vrot.slane %v400_v28, %v276_v61 }
 0x27f   : > { %v421_v38 = vrot.slane %v400_v28, %v280_v11  ;;  %v425_v58 = vrot.slane %v400_v28, %v284_v21  ;;  %v429_v60 = vrot.slane %v400_v28, %v288_v25  ;;  %v433_v11 = vrot.slane %v400_v28, %v292_v29 }
 0x280   : > { %689 = vrcp.f32 %v405_v30 }
 0x281   : > { %691 = vrcp.f32 %v409_v32 }
 0x282   : > { %693 = vrcp.f32 %v413_v33 }
 0x283   : > { %695 = vrcp.f32 %v417_v34 }
 0x284   : > { %697 = vrcp.f32 %v421_v38 }
 0x285   : > { %699 = vrcp.f32 %v425_v58 }
 0x286   : > { %701 = vrcp.f32 %v429_v60 }
 0x287   : > { %703 = vrcp.f32 %v433_v11 }
 0x28a   : > { %v690_v37 = vpop.eup %689 }
 0x28b   : > { %v443_v39 = vmul.f32 %v690_v37, %v674_v35  ;;  %v692_v41 = vpop.eup %691 }
 0x28c   : > { %v445_v59 = vmul.f32 %v692_v41, %v829_v36  ;;  %v694_v42 = vpop.eup %693 }
 0x28d   : > { %460 = vperm.xlu0 %672, %v443_v39   ;;  %v447_v61 = vmul.f32 %v694_v42, %v834_v40  ;;  %v696_v44 = vpop.eup %695 }
 0x28e   : > { %v449_v35 = vmul.f32 %v696_v44, %v837_v43  ;;  %v698_v49 = vpop.eup %697 }
 0x28f   : > { %v451_v21 = vmul.f32 %v698_v49, %v840_v45  ;;  %v700_v36 = vpop.eup %699 }
 0x290   : > { %v453_v50 = vmul.f32 %v700_v36, %v843_v46  ;;  %v702_v25 = vpop.eup %701 }
 0x291   : > { %465 = vperm.xlu0 %672, %v445_v59   ;;  %v455_v40 = vmul.f32 %v702_v25, %v846_v47  ;;  %v704_v51 = vpop.eup %703 }
 0x292   : > { %v457_v31 = vmul.f32 %v704_v51, %v849_v48 }
 0x295   : > { %470 = vperm.xlu0 %672, %v447_v61  }
 0x299   : > { %475 = vperm.xlu0 %672, %v449_v35  }
 0x29d   : > { %480 = vperm.xlu0 %672, %v451_v21  }
 0x2a1   : > { %485 = vperm.xlu0 %672, %v453_v50  }
 0x2a5   : > { %490 = vperm.xlu0 %672, %v455_v40  }
 0x2a9   : > { %495 = vperm.xlu0 %672, %v457_v31  }
 0x30c   : > { %v461_v29 = vpop.permute.xlu0 %460 }
 0x30d   : > { %v498_v45 = vmul.f32 %v645_v4, %v461_v29 }
 0x30f   : > { %v506_v48 = vsel %vm175_vm0, %v498_v45, 0.0 }
 0x310   : > { %v466_v43 = vpop.permute.xlu0 %465  ;;  %v507_v63 = vrot.slane %v506_v48, 4 }
 0x311   : > { %v499_v52 = vmul.f32 %v646_v6, %v466_v43 }
 0x312   : > { %v508_v13 = vadd.f32 %v507_v63, %v506_v48 }
 0x313   : > { %v513_v54 = vsel %vm175_vm0, %v499_v52, 0.0 }
 0x314   : > { %v471_v53 = vpop.permute.xlu0 %470  ;;  %v514_v57 = vrot.slane %v513_v54, 4  ;;  %v509_v24 = vrot.slane %v508_v13, 2 }
 0x315   : > { %v500_v46 = vmul.f32 %v649_v5, %v471_v53 }
 0x316   : > { %v515_v0 = vadd.f32 %v514_v57, %v513_v54 }
 0x317   : > { %v520_v47 = vsel %vm175_vm0, %v500_v46, 0.0 }
 0x318   : > { %v476_v55 = vpop.permute.xlu0 %475  ;;  %v521_v62 = vrot.slane %v520_v47, 4 }
 0x319   : > { %v501_v56 = vmul.f32 %v650_v7, %v476_v55  ;;  %v516_v7 = vrot.slane %v515_v0, 2 }
 0x31a   : > { %v522_v10 = vadd.f32 %v521_v62, %v520_v47 }
 0x31b   : > { %v527_v6 = vsel %vm175_vm0, %v501_v56, 0.0  ;;  %v517_v32 = vadd.f32 %v516_v7, %v515_v0 }
 0x31c   : > { %v528_v1 = vrot.slane %v527_v6, 4  ;;  %v481_v4 = vpop.permute.xlu0 %480  ;;  %v523_v22 = vrot.slane %v522_v10, 2 }
 0x31d   : > { %v502_v5 = vmul.f32 %v653_v8, %v481_v4  ;;  %v518_v42 = vrot.slane %v517_v32, 1 }
 0x31e   : > { %v529_v15 = vadd.f32 %v528_v1, %v527_v6  ;;  %v524_v34 = vadd.f32 %v523_v22, %v522_v10 }
 0x31f   : > { %v534_v12 = vsel %vm175_vm0, %v502_v5, 0.0  ;;  %v519_v50 = vadd.f32 %v518_v42, %v517_v32 }
 0x320   : > { %v535_v16 = vrot.slane %v534_v12, 4  ;;  %v486_v19 = vpop.permute.xlu0 %485  ;;  %v530_v26 = vrot.slane %v529_v15, 2 }
 0x321   : > { %v503_v2 = vmul.f32 %v654_v9, %v486_v19  ;;  %v510_v9 = vadd.f32 %v509_v24, %v508_v13 }
 0x322   : > { %v536_v20 = vadd.f32 %v535_v16, %v534_v12  ;;  %v531_v37 = vadd.f32 %v530_v26, %v529_v15 }
 0x323   : > { %v541_v23 = vsel %vm175_vm0, %v503_v2, 0.0  ;;  %v511_v11 = vrot.slane %v510_v9, 1 }
 0x324   : > { %v542_v27 = vrot.slane %v541_v23, 4  ;;  %v491_v8 = vpop.permute.xlu0 %490  ;;  %v537_v28 = vrot.slane %v536_v20, 2  ;;  %v532_v35 = vrot.slane %v531_v37, 1 }
 0x325   : > { %v504_v30 = vmul.f32 %v657_v17, %v491_v8  ;;  %v525_v17 = vrot.slane %v524_v34, 1  ;;  %v512_v14 = vadd.f32 %v511_v11, %v510_v9 }
 0x326   : > { %v543_v33 = vadd.f32 %v542_v27, %v541_v23  ;;  %v538_v58 = vadd.f32 %v537_v28, %v536_v20 }
 0x327   : > { %v548_v3 = vsel %vm175_vm0, %v504_v30, 0.0  ;;  %v526_v31 = vadd.f32 %v525_v17, %v524_v34  ;;  %v570_v53 = vsel %vm242_vm1, %v519_v50, %v512_v14 }
 0x328   : > { %v544_v38 = vrot.slane %v543_v33, 2  ;;  %v549_v39 = vrot.slane %v548_v3, 4  ;;  %v496_v41 = vpop.permute.xlu0 %495  ;;  %v539_v36 = vrot.slane %v538_v58, 1 }
 0x329   : > { %v505_v59 = vmul.f32 %v658_v18, %v496_v41  ;;  %v533_v18 = vadd.f32 %v532_v35, %v531_v37  ;;  %v571_v54 = vsel %vm244_vm2, %v526_v31, %v570_v53 }
 0x32a   : > { %v545_v60 = vadd.f32 %v544_v38, %v543_v33  ;;  %v550_v61 = vadd.f32 %v549_v39, %v548_v3  ;;  %v540_v52 = vadd.f32 %v539_v36, %v538_v58 }
 0x32b   : > { %v555_v44 = vsel %vm175_vm0, %v505_v59, 0.0  ;;  %v572_v55 = vsel %vm246_vm3, %v533_v18, %v571_v54 }
 0x32c   : > { %v551_v49 = vrot.slane %v550_v61, 2  ;;  %v556_v21 = vrot.slane %v555_v44, 4  ;;  %v546_v25 = vrot.slane %v545_v60, 1  ;;  %v573_v56 = vsel %vm248_vm4, %v540_v52, %v572_v55 }
 0x32e   : > { %v552_v40 = vadd.f32 %v551_v49, %v550_v61  ;;  %v557_v51 = vadd.f32 %v556_v21, %v555_v44  ;;  %v547_v45 = vadd.f32 %v546_v25, %v545_v60 }
 0x330   : > { %v553_v29 = vrot.slane %v552_v40, 1  ;;  %v558_v43 = vrot.slane %v557_v51, 2  ;;  %v574_v57 = vsel %vm250_vm5, %v547_v45, %v573_v56 }
 0x332   : > { %v559_v46 = vadd.f32 %v558_v43, %v557_v51  ;;  %v554_v47 = vadd.f32 %v553_v29, %v552_v40 }
 0x334   : > { %v560_v48 = vrot.slane %v559_v46, 1  ;;  %v575_v6 = vsel %vm252_vm6, %v554_v47, %v574_v57 }
 0x336   : > { %v561_v62 = vadd.f32 %v560_v48, %v559_v46 }
 0x338   : > { %v576_v63 = vsel %vm254_vm7, %v561_v62, %v575_v6 }
 0x339   : > { %578 = vst.msk [vmem:[%s143_s21] sm:$0xff] %vm175_vm0, %v576_v63 }
 0x33a PF: > { %s12_s9 = sadd.s32 1, %s711_s9  }
 0x33b   : > { %p9_p5 = scmp.ge.s32.totalorder %s12_s9, 4  }
 0x33d   :  { %11 = sbr.rel (!%p9_p5) target bundleno = 1 (0x1), region = 58 }

// kernel: projection_head.3
= control target key start
LH: loop header
LB: loop body
LE: loop exit
PB: predicated region body
PF: predicated region fallthrough
CT: control target
= control target key end

     0   :  { %vm40_vm0 = vcmask 261120   ;;  %s561_s0 = inlined_call_operand.vmem [shape: f32[16,32], index: 0, kind: input, shape index: {}]   ;;  %s562_s1 = inlined_call_operand.vmem [shape: f32[32,128], index: 1, kind: input, shape index: {}]   ;;  %s563_s2 = inlined_call_operand.vmem [shape: f32[1,128], index: 2, kind: input, shape index: {}]   ;;  %s564_s3 = inlined_call_operand.vmem [shape: f32[1,128], index: 3, kind: input, shape index: {}]   ;;  %s565_s4 = inlined_call_operand.vmem [shape: f32[1,128], index: 4, kind: input, shape index: {}]   ;;  %s566_s5 = inlined_call_operand.vmem [shape: f32[128,128], index: 5, kind: input, shape index: {}]   ;;  %s567_s6 = inlined_call_operand.vmem [shape: f32[1,128], index: 6, kind: input, shape index: {}]   ;;  %s568_s7 = inlined_call_operand.hbm [shape: f32[16,128], index: 7, kind: output, shape index: {}]  }
   0x1   :  { %v29_v0 = vld [vmem:[%s562_s1] sm:$0xff]  ;;  %v30_v1 = vld [vmem:[%s562_s1 + $0x8] sm:$0xff]  ;;  %v31_v2 = vld [vmem:[%s562_s1 + $0x10] sm:$0xff] }
   0x2   :  { %v359_v3 = vpack.c.bf16 %v30_v1, %v29_v0  ;;  %v32_v4 = vld [vmem:[%s562_s1 + $0x18] sm:$0xff]  ;;  %v27_v5 = vld [vmem:[%s561_s0] sm:$0xff] }
   0x3   :  { %v363_v6 = vpack.c.bf16 %v32_v4, %v31_v2  ;;  %321 = vmatprep.mubr.msk.f32.mxu0 %vm40_vm0, %v27_v5 }
   0x4   :  { %12 = vsyncpa [#allocation3], 0  ;;  %360 = vmatprep.subr.bf16.mxu0 %v359_v3  ;;  %v28_v7 = vld [vmem:[%s561_s0 + $0x8] sm:$0xff]  ;;  %v167_v8 = vld [vmem:[%s566_s5] sm:$0xff]  ;;  %s428_s24 = smov [#allocation2]  }
   0x5   :  { %362 = vmatpush3.bf16.msra.mxu0 %v359_v3  ;;  %v168_v9 = vld [vmem:[%s566_s5 + $0x8] sm:$0xff]  ;;  %v169_v11 = vld [vmem:[%s566_s5 + $0x10] sm:$0xff]  ;;  %v170_v12 = vld [vmem:[%s566_s5 + $0x18] sm:$0xff] }
   0x6   :  { %364 = vmatprep.subr.bf16.mxu0 %v363_v6  ;;  %v367_v10 = vpack.c.bf16 %v168_v9, %v167_v8  ;;  %v371_v13 = vpack.c.bf16 %v170_v12, %v169_v11  ;;  %v171_v14 = vld [vmem:[%s566_s5 + $0x20] sm:$0xff]  ;;  %v172_v15 = vld [vmem:[%s566_s5 + $0x28] sm:$0xff]  ;;  %v173_v17 = vld [vmem:[%s566_s5 + $0x30] sm:$0xff] }
   0x7   :  { %v375_v16 = vpack.c.bf16 %v172_v15, %v171_v14  ;;  %v174_v18 = vld [vmem:[%s566_s5 + $0x38] sm:$0xff]  ;;  %v175_v20 = vld [vmem:[%s566_s5 + $0x40] sm:$0xff]  ;;  %v176_v21 = vld [vmem:[%s566_s5 + $0x48] sm:$0xff] }
   0x8   :  { %368 = vmatprep.subr.bf16.mxu1 %v367_v10  ;;  %v379_v19 = vpack.c.bf16 %v174_v18, %v173_v17  ;;  %v177_v22 = vld [vmem:[%s566_s5 + $0x50] sm:$0xff]  ;;  %v383_v23 = vpack.c.bf16 %v176_v21, %v175_v20  ;;  %v178_v24 = vld [vmem:[%s566_s5 + $0x58] sm:$0xff]  ;;  %v179_v26 = vld [vmem:[%s566_s5 + $0x60] sm:$0xff] }
   0x9   :  { %366 = vmatpush3.bf16.msra.mxu0 %v363_v6  ;;  %370 = vmatpush3.bf16.msra.mxu1 %v367_v10  ;;  %v387_v25 = vpack.c.bf16 %v178_v24, %v177_v22  ;;  %v180_v27 = vld [vmem:[%s566_s5 + $0x68] sm:$0xff]  ;;  %v181_v29 = vld [vmem:[%s566_s5 + $0x70] sm:$0xff]  ;;  %v182_v30 = vld [vmem:[%s566_s5 + $0x78] sm:$0xff] }
   0xa   :  { %372 = vmatprep.subr.bf16.mxu1 %v371_v13  ;;  %v391_v28 = vpack.c.bf16 %v180_v27, %v179_v26  ;;  %v395_v31 = vpack.c.bf16 %v182_v30, %v181_v29  ;;  %v283_v32 = vld [vmem:[%s563_s2] ss:$0 sm:$0xff] }
   0xb   :  { %v286_v59 = vld [vmem:[%s564_s3] ss:$0 sm:$0xff]  ;;  %s272_s3 = sshll.u32 %s428_s24, 4  ;;  %s273_s3 = int_to_ptr.vmem [resolvable:$true] %s272_s3 }
   0xc   :  { %322 = vmatmul.mubr.msk.f32.vlgmr.msra.gmra.mrb[0].mxu0 %vm40_vm0, %v28_v7  ;;  %v287_v62 = vld [vmem:[%s565_s4] ss:$0 sm:$0xff]  ;;  %s404_s4 = scalar_lea.vmem %s273_s3, 256  ;;  %p409_p1 = scmp.lt.s32.totalorder %s273_s3, %s273_s3 }
   0xd   :  { %374 = vmatpush3.bf16.msra.mxu1 %v371_v13  ;;  %v288_v5 = vld [vmem:[%s567_s6] ss:$0 sm:$0xff]  ;;  %p405_p0 = scmp.ne.s32.totalorder %s273_s3, %s404_s4  ;;  %p410_p2 = scmp.lt.s32.totalorder %s404_s4, %s404_s4 }
   0xe   :  { %376 = vmatprep.subr.bf16.mxu1 %v375_v16 }
   0xf   :  { %p411_p3 = por %p410_p2, %p409_p1 }
  0x11   :  { %378 = vmatpush3.bf16.msra.mxu1 %v375_v16  ;;  %p412_p4 = pnand %p411_p3, %p405_p0 }
  0x12   :  { %380 = vmatprep.subr.bf16.mxu1 %v379_v19 }
  0x15   :  { %382 = vmatpush3.bf16.msra.mxu1 %v379_v19 }
  0x16   :  { %384 = vmatprep.subr.bf16.mxu1 %v383_v23 }
  0x19   :  { %386 = vmatpush3.bf16.msra.mxu1 %v383_v23 }
  0x1a   :  { %388 = vmatprep.subr.bf16.mxu1 %v387_v25 }
  0x1d   :  { %390 = vmatpush3.bf16.msra.mxu1 %v387_v25 }
  0x1e   :  { %392 = vmatprep.subr.bf16.mxu1 %v391_v28 }
  0x21   :  { %394 = vmatpush3.bf16.msra.mxu1 %v391_v28 }
  0x22   :  { %396 = vmatprep.subr.bf16.mxu1 %v395_v31 }
  0x25   :  { %398 = vmatpush3.bf16.msra.mxu1 %v395_v31 }
  0xdf   :  { %v323_v33 = vpop.f32.mrb[0].mxu0 }
  0xe0   :  { %v119_v34 = vadd.f32 %v323_v33, %v283_v32  ;;  %v113_v35 = vpop.f32.mrb[1].mxu0 }
  0xe1   :  { %v114_v36 = vadd.f32 %v283_v32, %v113_v35 }
  0xe3   :  { %v122_v37 = vadd.f32 %v119_v34, %v114_v36 }
  0xe5   :  { %v123_v38 = vrot.slane %v122_v37, 4 }
  0xe7   :  { %v124_v39 = vadd.f32 %v123_v38, %v122_v37 }
  0xe9   :  { %v125_v40 = vrot.slane %v124_v39, 2 }
  0xeb   :  { %v126_v41 = vadd.f32 %v125_v40, %v124_v39 }
  0xed   :  { %v127_v42 = vrot.slane %v126_v41, 1 }
  0xef   :  { %v128_v43 = vadd.f32 %v127_v42, %v126_v41 }
  0xf1   :  { %v130_v44 = vmul.f32 0.0625, %v128_v43 }
  0xf3   :  { %v131_v45 = vsub.f32 %v114_v36, %v130_v44  ;;  %v132_v46 = vsub.f32 %v119_v34, %v130_v44 }
  0xf5   :  { %v133_v47 = vmul.f32 %v131_v45, %v131_v45  ;;  %v134_v48 = vmul.f32 %v132_v46, %v132_v46 }
  0xf7   :  { %v135_v49 = vadd.f32 %v134_v48, %v133_v47 }
  0xf9   :  { %v136_v50 = vrot.slane %v135_v49, 4 }
  0xfb   :  { %v137_v51 = vadd.f32 %v136_v50, %v135_v49 }
  0xfd   :  { %v138_v52 = vrot.slane %v137_v51, 2 }
  0xff   :  { %v139_v53 = vadd.f32 %v138_v52, %v137_v51 }
 0x101   :  { %v140_v54 = vrot.slane %v139_v53, 1 }
 0x103   :  { %v141_v55 = vadd.f32 %v140_v54, %v139_v53 }
 0x105   :  { %v142_v56 = vmul.f32 0.0625, %v141_v55 }
 0x107   :  { %v143_v57 = vadd.f32 1e-05, %v142_v56 }
 0x109   :  { %402 = vrsqrt.f32 %v143_v57 }
 0x113   :  { %v403_v58 = vpop.eup %402 }
 0x114   :  { %v145_v60 = vmul.f32 %v403_v58, %v131_v45  ;;  %v146_v61 = vmul.f32 %v403_v58, %v132_v46 }
 0x116   :  { %v154_v63 = vmul.f32 %v286_v59, %v145_v60  ;;  %v155_v0 = vmul.f32 %v286_v59, %v146_v61 }
 0x118   :  { %v163_v1 = vadd.f32 %v287_v62, %v154_v63  ;;  %v164_v2 = vadd.f32 %v287_v62, %v155_v0 }
 0x11a   :  { %v165_v3 = vmax.f32 %v163_v1, 0.0  ;;  %v166_v4 = vmax.f32 %v164_v2, 0.0 }
 0x11c   :  { %356 = vmatprep.mubr.f32.mxu1 %v165_v3 }
 0x11d   :  { %357 = vmatmul.mubr.f32.vlgmr.msra.gmra.mrb[0].mxu1 %v166_v4 }
 0x1f0   :  { %v358_v6 = vpop.f32.mrb[0].mxu1 }
 0x1f1   :  { %v262_v7 = vadd.f32 %v358_v6, %v288_v5  ;;  %v256_v8 = vpop.f32.mrb[1].mxu1 }
 0x1f2   :  { %v257_v9 = vadd.f32 %v288_v5, %v256_v8 }
 0x1f3   :  { %266 = vst [vmem:[#allocation2 + $0x8] sm:$0xff] %v262_v7 }
 0x1f4   :  { %265 = vst [vmem:[#allocation2] sm:$0xff] %v257_v9 }
 0x1f5   :  { %415 = shalt.err (!%p412_p4)
}
 0x1f6   :  { %s416_s6 = scalar_lea.hbm %s568_s7, 256 }
 0x1f7   :  { %p417_p5 = scmp.ne.s32.totalorder %s568_s7, %s416_s6  ;;  %p420_p6 = scmp.lt.u32.totalorder %s416_s6, %s568_s7 }
 0x1f9   :  { %p422_p7 = pnand %p420_p6, %p417_p5 }
 0x1fb   :  { %425 = shalt.err (!%p422_p7)
}
 0x1fc   :  { %s429_s8 = smov 128   ;;  %s430_s9 = smov 8  }
 0x1fd   :  { %278 = dma.vmem_to_hbm [thread:$0]  %s273_s3, 256, %s568_s7, [#allocation3], %s429_s8, %s429_s8, %s430_s9  }
 0x1fe   :  { %426 = dma.done.wait [#allocation3], 256  }
 0x1ff   :  { %427 = vsyncadd [#allocation3], 4294967040 }
 0x200   :  { %282 = vsyncpa [#allocation3], 1 }

</bundles_post_ra>
